<compile_context>
chip_gen: v7x
topology: tpu7x:2x2x1
jax: 0.10.0
libtpu: 0.0.40
codegen_flags: <defaults>
</compile_context>

<pallas_src>
import functools

import jax
import jax.numpy as jnp
from jax.experimental import pallas as pl
from jax.experimental.pallas import tpu as pltpu

_LANE = 128


def _round_up(x, m):
    return (x + m - 1) // m * m


def _pad2d(a, rows, cols):
    """Zero-pad a 2D array up to (rows, cols)."""
    out = jnp.zeros((rows, cols), a.dtype)
    return out.at[: a.shape[0], : a.shape[1]].set(a)


# ---------------------------------------------------------------------------
# Fused two-layer kernel (whole graph resident in VMEM).
# ---------------------------------------------------------------------------
def _sage_fused_kernel(dinv_ref, a_ref, x_ref, w1_ref, b1_ref, w2_ref, b2_ref, o_ref):
    a = a_ref[...].astype(jnp.float32)   # (N, N)  adjacency, bf16 storage (0/1 exact)
    x = x_ref[...]                       # (N, F1p) f32
    dinv = dinv_ref[...]                 # (N, 1)   f32, precomputed 1/max(deg,1)

    # ---- layer 1: mean aggregation + fused (self | neigh) projection + ReLU
    neigh1 = jnp.dot(a, x, preferred_element_type=jnp.float32) * dinv
    h = jnp.dot(jnp.concatenate([x, neigh1], axis=-1), w1_ref[...],
                preferred_element_type=jnp.float32) + b1_ref[...]
    h = jnp.maximum(h, 0.0)

    # ---- layer 2 (same adjacency + same dinv, reused from VMEM)
    neigh2 = jnp.dot(a, h, preferred_element_type=jnp.float32) * dinv
    out = jnp.dot(jnp.concatenate([h, neigh2], axis=-1), w2_ref[...],
                  preferred_element_type=jnp.float32) + b2_ref[...]
    o_ref[...] = out.astype(o_ref.dtype)


def _graphsage_fused(adj_bf16, x_pad, dinv, w1, b1, w2, b2):
    n, _ = x_pad.shape
    hp = w1.shape[1]

    def full(shape):
        return pl.BlockSpec(shape, lambda i: (0, 0))

    return pl.pallas_call(
        _sage_fused_kernel,
        out_shape=jax.ShapeDtypeStruct((n, hp), jnp.float32),
        grid_spec=pl.GridSpec(
            grid=(1,),
            in_specs=[
                full(dinv.shape),       # deg_inv (N, 1)
                full(adj_bf16.shape),   # A       (N, N) bf16
                full(x_pad.shape),      # X       (N, F1p)
                full(w1.shape),         # Wcat1   (2*F1p, Hp)
                full(b1.shape),         # b1      (1, Hp)
                full(w2.shape),         # Wcat2   (2*Hp, Hp)
                full(b2.shape),         # b2      (1, Hp)
            ],
            out_specs=pl.BlockSpec((n, hp), lambda i: (0, 0)),
        ),
        compiler_params=pltpu.CompilerParams(
            dimension_semantics=("arbitrary",),
            vmem_limit_bytes=32 * 1024 * 1024,
        ),
    )(dinv, adj_bf16, x_pad, w1, b1, w2, b2)


# ---------------------------------------------------------------------------
# Tiled single-layer kernel (for graphs whose adjacency doesn't fit VMEM).
# Grid: (row tiles [parallel], adjacency column tiles [arbitrary, reduction]).
# ---------------------------------------------------------------------------
def _sage_layer_tiled_kernel(dinv_ref, a_ref, xk_ref, xself_ref, w_ref, b_ref,
                             o_ref, acc_ref, *, apply_relu):
    k = pl.program_id(1)

    @pl.when(k == 0)
    def _init():
        acc_ref[...] = jnp.zeros_like(acc_ref)

    # Steady state: one MXU push per k-step, unnormalized neighbor sum.
    a_blk = a_ref[...].astype(jnp.float32)                       # (tm, tk)
    acc_ref[...] += jnp.dot(a_blk, xk_ref[...],
                            preferred_element_type=jnp.float32)  # (tm, Fp)

    @pl.when(k == pl.num_programs(1) - 1)
    def _finalize():
        neigh = acc_ref[...] * dinv_ref[...]                       # (tm, Fp)
        cat = jnp.concatenate([xself_ref[...], neigh], axis=-1)    # (tm, 2*Fp)
        out = jnp.dot(cat, w_ref[...],
                      preferred_element_type=jnp.float32) + b_ref[...]
        if apply_relu:
            out = jnp.maximum(out, 0.0)
        o_ref[...] = out.astype(o_ref.dtype)


def _sage_layer_tiled(adj_bf16, x_pad, dinv, w_cat, bias, *, apply_relu,
                      tm=128, tk=128):
    n, f_p = x_pad.shape
    hp = w_cat.shape[1]
    grid = (n // tm, n // tk)
    kernel = functools.partial(_sage_layer_tiled_kernel, apply_relu=apply_relu)
    return pl.pallas_call(
        kernel,
        out_shape=jax.ShapeDtypeStruct((n, hp), jnp.float32),
        grid_spec=pltpu.PrefetchScalarGridSpec(
            num_scalar_prefetch=0,
            grid=grid,
            in_specs=[
                pl.BlockSpec((tm, 1), lambda i, k: (i, 0)),       # deg_inv rows
                pl.BlockSpec((tm, tk), lambda i, k: (i, k)),      # A tile
                pl.BlockSpec((tk, f_p), lambda i, k: (k, 0)),     # X k-slab (aggregation)
                pl.BlockSpec((tm, f_p), lambda i, k: (i, 0)),     # X row-slab (self term)
                pl.BlockSpec(w_cat.shape, lambda i, k: (0, 0)),   # Wcat (2*Fp, Hp)
                pl.BlockSpec(bias.shape, lambda i, k: (0, 0)),    # bias (1, Hp)
            ],
            out_specs=pl.BlockSpec((tm, hp), lambda i, k: (i, 0)),
            scratch_shapes=[pltpu.VMEM((tm, f_p), jnp.float32)],
        ),
        compiler_params=pltpu.CompilerParams(
            dimension_semantics=("parallel", "arbitrary"),
            vmem_limit_bytes=32 * 1024 * 1024,
        ),
    )(dinv, adj_bf16, x_pad, x_pad, w_cat, bias)


# ---------------------------------------------------------------------------
# Forward wrapper
# ---------------------------------------------------------------------------
def _fused_vmem_estimate(n, f1p, hp):
    # bf16 adjacency (x2 buffering margin) + f32 features / intermediates + weights
    return (2 * n * n * 2
            + 4 * n * (3 * f1p + 4 * hp)
            + 4 * (2 * f1p * hp + 2 * hp * hp + 2 * hp))


def graphsage_forward(adj, x, params, *, tm=128, tk=128,
                      fused_vmem_budget=20 * 1024 * 1024, force_tiled=False):
    """Two-layer GraphSAGE forward: SAGEConv -> ReLU -> SAGEConv."""
    n, f_in = x.shape
    h_feats = params["w_self1"].shape[1]

    f1p = _round_up(f_in, _LANE)     # lane-dense input feature width
    hp = _round_up(h_feats, _LANE)   # lane-dense hidden/output width

    # Exact inverse degree, computed ONCE in f32 and reused by both layers.
    deg = jnp.sum(adj.astype(jnp.float32), axis=1, keepdims=True)
    dinv = (1.0 / jnp.maximum(deg, 1.0)).astype(jnp.float32)

    # Fused (self | neigh) projection weights, zero-padded to lane-dense shapes.
    w1 = jnp.concatenate([_pad2d(params["w_self1"], f1p, hp),
                          _pad2d(params["w_neigh1"], f1p, hp)], axis=0)
    w2 = jnp.concatenate([_pad2d(params["w_self2"], hp, hp),
                          _pad2d(params["w_neigh2"], hp, hp)], axis=0)
    b1 = _pad2d(params["b1"].reshape(1, -1), 1, hp)
    b2 = _pad2d(params["b2"].reshape(1, -1), 1, hp)

    use_fused = (not force_tiled) and \
        _fused_vmem_estimate(n, f1p, hp) <= fused_vmem_budget

    if use_fused:
        a_bf16 = adj.astype(jnp.bfloat16)                 # 0/1 values -> lossless
        x_pad = _pad2d(x.astype(jnp.float32), n, f1p)
        out = _graphsage_fused(a_bf16, x_pad, dinv, w1, b1, w2, b2)
        return out[:n, :h_feats]

    # Tiled path for large graphs: pad N to a multiple of the tile sizes.
    np_t = _round_up(n, max(tm, tk))
    a_pad = _pad2d(adj.astype(jnp.float32), np_t, np_t).astype(jnp.bfloat16)
    x_pad = _pad2d(x.astype(jnp.float32), np_t, f1p)
    dinv_pad = _pad2d(dinv, np_t, 1)
    h = _sage_layer_tiled(a_pad, x_pad, dinv_pad, w1, b1,
                          apply_relu=True, tm=tm, tk=tk)
    out = _sage_layer_tiled(a_pad, h, dinv_pad, w2, b2,
                            apply_relu=False, tm=tm, tk=tk)
    return out[:n, :h_feats]


def init_params(key, in_feats, h_feats):
    k1, k2, k3, k4 = jax.random.split(key, 4)
    scale1 = 1.0 / jnp.sqrt(in_feats)
    scale2 = 1.0 / jnp.sqrt(h_feats)
    return {
        "w_self1": jax.random.normal(k1, (in_feats, h_feats), jnp.float32) * scale1,
        "w_neigh1": jax.random.normal(k2, (in_feats, h_feats), jnp.float32) * scale1,
        "b1": jnp.zeros((1, h_feats), jnp.float32),
        "w_self2": jax.random.normal(k3, (h_feats, h_feats), jnp.float32) * scale2,
        "w_neigh2": jax.random.normal(k4, (h_feats, h_feats), jnp.float32) * scale2,
        "b2": jnp.zeros((1, h_feats), jnp.float32),
    }


def _make_graph(key, n, p=0.3):
    a_rand = jax.random.uniform(key, (n, n))
    adj = (a_rand < p).astype(jnp.float32)
    adj = jnp.maximum(adj, adj.T)                        # symmetrize
    adj = adj * (1.0 - jnp.eye(n, dtype=jnp.float32))    # no self loops
    return adj


def _ref_layer(adj, x, ws, wn, b, relu):
    deg = jnp.maximum(adj.sum(axis=1, keepdims=True), 1.0)
    neigh = (adj @ x) / deg
    o = x @ ws + neigh @ wn + b
    return jnp.maximum(o, 0.0) if relu else o


def _ref_forward(adj, x, params):
    h = _ref_layer(adj, x, params["w_self1"], params["w_neigh1"], params["b1"], True)
    return _ref_layer(adj, h, params["w_self2"], params["w_neigh2"], params["b2"], False)


if __name__ == "__main__":
    IN_FEATS = 8
    H_FEATS = 32

    key = jax.random.PRNGKey(0)
    k_adj, k_x, k_p, k_adj2, k_x2 = jax.random.split(key, 5)
    params = init_params(k_p, IN_FEATS, H_FEATS)

    # ---- Test 1: small graph, fully fused two-layer kernel --------------------
    N1 = 16
    adj1 = _make_graph(k_adj, N1)
    x1 = jax.random.normal(k_x, (N1, IN_FEATS), jnp.float32)
    out1 = graphsage_forward(adj1, x1, params)
    jax.block_until_ready(out1)
    ref1 = _ref_forward(adj1, x1, params)
    assert out1.shape == (N1, H_FEATS)
    assert jnp.allclose(out1, ref1, atol=1e-4, rtol=1e-4), "fused path mismatch"

    # ---- Test 2: larger graph forced down the tiled (parallel x arbitrary) path
    N2 = 200
    adj2 = _make_graph(k_adj2, N2, p=0.1)
    x2 = jax.random.normal(k_x2, (N2, IN_FEATS), jnp.float32)
    out2 = graphsage_forward(adj2, x2, params, tm=128, tk=128, force_tiled=True)
    jax.block_until_ready(out2)
    ref2 = _ref_forward(adj2, x2, params)
    assert out2.shape == (N2, H_FEATS)
    assert jnp.allclose(out2, ref2, atol=1e-4, rtol=1e-4), "tiled path mismatch"

    print("KERNEL_OK")
</pallas_src>

<mosaic_0001>
module attributes {stable_mosaic.version = 11 : i64} {
  func.func @_sage_fused_kernel(%arg0: i32, %arg1: memref<16x1xf32, #tpu.memory_space<vmem>>, %arg2: memref<16x16xbf16, #tpu.memory_space<vmem>>, %arg3: memref<16x128xf32, #tpu.memory_space<vmem>>, %arg4: memref<256x128xf32, #tpu.memory_space<vmem>>, %arg5: memref<1x128xf32, #tpu.memory_space<vmem>>, %arg6: memref<256x128xf32, #tpu.memory_space<vmem>>, %arg7: memref<1x128xf32, #tpu.memory_space<vmem>>, %arg8: memref<16x128xf32, #tpu.memory_space<vmem>>) attributes {dimension_semantics = [#tpu.dimension_semantics<arbitrary>], iteration_bounds = array<i64: 1>, scalar_prefetch = 0 : i64, scratch_operands = 0 : i64, tpu.core_type = #tpu.core_type<tc>, window_params = [{pipeline_mode = #tpu.pipeline_mode<synchronous>, transform_indices = @transform_0, window_bounds = array<i64: 16, 1>}, {pipeline_mode = #tpu.pipeline_mode<synchronous>, transform_indices = @transform_1, window_bounds = array<i64: 16, 16>}, {pipeline_mode = #tpu.pipeline_mode<synchronous>, transform_indices = @transform_2, window_bounds = array<i64: 16, 128>}, {pipeline_mode = #tpu.pipeline_mode<synchronous>, transform_indices = @transform_3, window_bounds = array<i64: 256, 128>}, {pipeline_mode = #tpu.pipeline_mode<synchronous>, transform_indices = @transform_4, window_bounds = array<i64: 1, 128>}, {pipeline_mode = #tpu.pipeline_mode<synchronous>, transform_indices = @transform_5, window_bounds = array<i64: 256, 128>}, {pipeline_mode = #tpu.pipeline_mode<synchronous>, transform_indices = @transform_6, window_bounds = array<i64: 1, 128>}, {pipeline_mode = #tpu.pipeline_mode<synchronous>, transform_indices = @transform_7, window_bounds = array<i64: 16, 128>}]} {
    %c0 = arith.constant 0 : index
    %c0_0 = arith.constant 0 : index
    %0 = vector.load %arg2[%c0, %c0_0] : memref<16x16xbf16, #tpu.memory_space<vmem>>, vector<16x16xbf16>
    %1 = arith.extf %0 : vector<16x16xbf16> to vector<16x16xf32>
    %c0_1 = arith.constant 0 : index
    %c0_2 = arith.constant 0 : index
    %2 = vector.load %arg3[%c0_1, %c0_2] : memref<16x128xf32, #tpu.memory_space<vmem>>, vector<16x128xf32>
    %c0_3 = arith.constant 0 : index
    %c0_4 = arith.constant 0 : index
    %3 = vector.load %arg1[%c0_3, %c0_4] : memref<16x1xf32, #tpu.memory_space<vmem>>, vector<16x1xf32>
    %cst = arith.constant dense<0.000000e+00> : vector<16x128xf32>
    %4 = tpu.matmul %1, %2, %cst {dimension_numbers = #tpu.dot_dimension_numbers<[1], [0], [0], [1], [0, 0, 1, 1], [], []>} : vector<16x16xf32>, vector<16x128xf32>, vector<16x128xf32> -> vector<16x128xf32>
    %5 = vector.broadcast %3 : vector<16x1xf32> to vector<16x128xf32>
    %6 = arith.mulf %4, %5 : vector<16x128xf32>
    %7 = tpu.concatenate %2, %6 in 1 : vector<16x128xf32>, vector<16x128xf32> -> vector<16x256xf32>
    %c0_5 = arith.constant 0 : index
    %c0_6 = arith.constant 0 : index
    %8 = vector.load %arg4[%c0_5, %c0_6] : memref<256x128xf32, #tpu.memory_space<vmem>>, vector<256x128xf32>
    %cst_7 = arith.constant dense<0.000000e+00> : vector<16x128xf32>
    %9 = tpu.matmul %7, %8, %cst_7 {dimension_numbers = #tpu.dot_dimension_numbers<[1], [0], [0], [1], [0, 0, 1, 1], [], []>} : vector<16x256xf32>, vector<256x128xf32>, vector<16x128xf32> -> vector<16x128xf32>
    %c0_8 = arith.constant 0 : index
    %c0_9 = arith.constant 0 : index
    %10 = vector.load %arg5[%c0_8, %c0_9] : memref<1x128xf32, #tpu.memory_space<vmem>>, vector<1x128xf32>
    %11 = vector.broadcast %10 : vector<1x128xf32> to vector<16x128xf32>
    %12 = arith.addf %9, %11 : vector<16x128xf32>
    %cst_10 = arith.constant 0.000000e+00 : f32
    %13 = vector.broadcast %cst_10 : f32 to vector<16x128xf32>
    %14 = arith.maximumf %12, %13 : vector<16x128xf32>
    %cst_11 = arith.constant dense<0.000000e+00> : vector<16x128xf32>
    %15 = tpu.matmul %1, %14, %cst_11 {dimension_numbers = #tpu.dot_dimension_numbers<[1], [0], [0], [1], [0, 0, 1, 1], [], []>} : vector<16x16xf32>, vector<16x128xf32>, vector<16x128xf32> -> vector<16x128xf32>
    %16 = vector.broadcast %3 : vector<16x1xf32> to vector<16x128xf32>
    %17 = arith.mulf %15, %16 : vector<16x128xf32>
    %18 = tpu.concatenate %14, %17 in 1 : vector<16x128xf32>, vector<16x128xf32> -> vector<16x256xf32>
    %c0_12 = arith.constant 0 : index
    %c0_13 = arith.constant 0 : index
    %19 = vector.load %arg6[%c0_12, %c0_13] : memref<256x128xf32, #tpu.memory_space<vmem>>, vector<256x128xf32>
    %cst_14 = arith.constant dense<0.000000e+00> : vector<16x128xf32>
    %20 = tpu.matmul %18, %19, %cst_14 {dimension_numbers = #tpu.dot_dimension_numbers<[1], [0], [0], [1], [0, 0, 1, 1], [], []>} : vector<16x256xf32>, vector<256x128xf32>, vector<16x128xf32> -> vector<16x128xf32>
    %c0_15 = arith.constant 0 : index
    %c0_16 = arith.constant 0 : index
    %21 = vector.load %arg7[%c0_15, %c0_16] : memref<1x128xf32, #tpu.memory_space<vmem>>, vector<1x128xf32>
    %22 = vector.broadcast %21 : vector<1x128xf32> to vector<16x128xf32>
    %23 = arith.addf %20, %22 : vector<16x128xf32>
    %c0_17 = arith.constant 0 : index
    %c0_18 = arith.constant 0 : index
    %24 = vector.load %arg8[%c0_17, %c0_18] : memref<16x128xf32, #tpu.memory_space<vmem>>, vector<16x128xf32>
    tpu.vector_store %arg8[%c0_17, %c0_18], %23 {strides = array<i32>} : memref<16x128xf32, #tpu.memory_space<vmem>>, vector<16x128xf32>,
    return
  }
  func.func @transform_0(%arg0: i32) -> (i32, i32) {
    %c0_i32 = arith.constant 0 : i32
    %c0_i32_0 = arith.constant 0 : i32
    %c0_i32_1 = arith.constant 0 : i32
    return %c0_i32, %c0_i32_0 : i32, i32
  }
  func.func @transform_1(%arg0: i32) -> (i32, i32) {
    %c0_i32 = arith.constant 0 : i32
    %c0_i32_0 = arith.constant 0 : i32
    %c0_i32_1 = arith.constant 0 : i32
    return %c0_i32, %c0_i32_0 : i32, i32
  }
  func.func @transform_2(%arg0: i32) -> (i32, i32) {
    %c0_i32 = arith.constant 0 : i32
    %c0_i32_0 = arith.constant 0 : i32
    %c0_i32_1 = arith.constant 0 : i32
    return %c0_i32, %c0_i32_0 : i32, i32
  }
  func.func @transform_3(%arg0: i32) -> (i32, i32) {
    %c0_i32 = arith.constant 0 : i32
    %c0_i32_0 = arith.constant 0 : i32
    %c0_i32_1 = arith.constant 0 : i32
    return %c0_i32, %c0_i32_0 : i32, i32
  }
  func.func @transform_4(%arg0: i32) -> (i32, i32) {
    %c0_i32 = arith.constant 0 : i32
    %c0_i32_0 = arith.constant 0 : i32
    %c0_i32_1 = arith.constant 0 : i32
    return %c0_i32, %c0_i32_0 : i32, i32
  }
  func.func @transform_5(%arg0: i32) -> (i32, i32) {
    %c0_i32 = arith.constant 0 : i32
    %c0_i32_0 = arith.constant 0 : i32
    %c0_i32_1 = arith.constant 0 : i32
    return %c0_i32, %c0_i32_0 : i32, i32
  }
  func.func @transform_6(%arg0: i32) -> (i32, i32) {
    %c0_i32 = arith.constant 0 : i32
    %c0_i32_0 = arith.constant 0 : i32
    %c0_i32_1 = arith.constant 0 : i32
    return %c0_i32, %c0_i32_0 : i32, i32
  }
  func.func @transform_7(%arg0: i32) -> (i32, i32) {
    %c0_i32 = arith.constant 0 : i32
    %c0_i32_0 = arith.constant 0 : i32
    %c0_i32_1 = arith.constant 0 : i32
    return %c0_i32, %c0_i32_0 : i32, i32
  }
}

</mosaic_0001>

<bundles_post_ra>
// kernel: tpu_custom_call.1
= control target key start
LH: loop header
LB: loop body
LE: loop exit
PB: predicated region body
PF: predicated region fallthrough
CT: control target
= control target key end

     0   :  { %12 = vsyncpa [#allocation3], 0  ;;  %s897_s0 = inlined_call_operand.vmem [shape: f32[16,1], index: 0, kind: input, shape index: {}]   ;;  %s898_s1 = inlined_call_operand.vmem [shape: bf16[16,16], index: 1, kind: input, shape index: {}]   ;;  %s899_s2 = inlined_call_operand.vmem [shape: f32[16,128], index: 2, kind: input, shape index: {}]   ;;  %s900_s3 = inlined_call_operand.hbm [shape: f32[256,128], index: 3, kind: input, shape index: {}]   ;;  %s901_s4 = inlined_call_operand.vmem [shape: f32[1,128], index: 4, kind: input, shape index: {}]   ;;  %s902_s5 = inlined_call_operand.hbm [shape: f32[256,128], index: 5, kind: input, shape index: {}]   ;;  %s903_s6 = inlined_call_operand.vmem [shape: f32[1,128], index: 6, kind: input, shape index: {}]   ;;  %s904_s7 = inlined_call_operand.hbm [shape: f32[16,128], index: 7, kind: output, shape index: {}]  }
   0x1   :  { %13 = vsyncpa [#allocation6], 0 }
   0x2   :  { %14 = vsyncpa [#allocation4], 0  ;;  %s743_s24 = smov [#allocation2]   ;;  %s671_s28 = scalar_lea.hbm %s900_s3, 4096 }
   0x3   :  { %s26_s25 = sshll.u32 %s743_s24, 4  ;;  %p672_p0 = scmp.ne.s32.totalorder %s900_s3, %s671_s28  ;;  %s27_s25 = int_to_ptr.vmem [resolvable:$true] %s26_s25 }
   0x4   :  { %p675_p1 = scmp.lt.u32.totalorder %s671_s28, %s900_s3 }
   0x6   :  { %p677_p2 = pnand %p675_p1, %p672_p0 }
   0x8   :  { %680 = shalt.err (!%p677_p2)
}
   0x9   :  { %s681_s10 = scalar_lea.vmem %s27_s25, 4096  ;;  %p686_p4 = scmp.lt.s32.totalorder %s27_s25, %s27_s25 }
   0xa   :  { %p682_p3 = scmp.ne.s32.totalorder %s27_s25, %s681_s10  ;;  %p687_p5 = scmp.lt.s32.totalorder %s681_s10, %s681_s10 }
   0xc   :  { %p688_p6 = por %p687_p5, %p686_p4 }
   0xe   :  { %p689_p7 = pnand %p688_p6, %p682_p3 }
  0x10   :  { %692 = shalt.err (!%p689_p7)
}
  0x11   :  { %s744_s11 = smov 128   ;;  %s745_s12 = smov 8  }
  0x12   :  { %32 = dma.hbm_to_vmem [thread:$0]  %s900_s3, 4096, %s27_s25, [#allocation3], %s744_s11, %s744_s11, %s745_s12  }
  0x13   :  { %s746_s15 = smov [#allocation5]   ;;  %s693_s19 = scalar_lea.hbm %s902_s5, 4096 }
  0x14   :  { %s40_s16 = sshll.u32 %s746_s15, 4  ;;  %p694_p8 = scmp.ne.s32.totalorder %s902_s5, %s693_s19  ;;  %s41_s16 = int_to_ptr.vmem [resolvable:$true] %s40_s16 }
  0x15   :  { %p697_p9 = scmp.lt.u32.totalorder %s693_s19, %s902_s5 }
  0x17   :  { %p699_p10 = pnand %p697_p9, %p694_p8 }
  0x19   :  { %702 = shalt.err (!%p699_p10)
}
  0x1a   :  { %s703_s24 = scalar_lea.vmem %s41_s16, 4096  ;;  %p708_p12 = scmp.lt.s32.totalorder %s41_s16, %s41_s16 }
  0x1b   :  { %p704_p11 = scmp.ne.s32.totalorder %s41_s16, %s703_s24  ;;  %p709_p13 = scmp.lt.s32.totalorder %s703_s24, %s703_s24 }
  0x1d   :  { %p710_p0 = por %p709_p13, %p708_p12 }
  0x1f   :  { %p711_p1 = pnand %p710_p0, %p704_p11 }
  0x21   :  { %714 = shalt.err (!%p711_p1)
}
  0x22   :  { %46 = dma.hbm_to_vmem [thread:$0]  %s902_s5, 4096, %s41_s16, [#allocation6], %s744_s11, %s744_s11, %s745_s12  }
  0x23   :  { %737 = dma.done.wait [#allocation3], 4096  }
  0x24   :  { %738 = vsyncadd [#allocation3], 4294963200 }
  0x25   :  { %739 = dma.done.wait [#allocation6], 4096  }
  0x26   :  { %740 = vsyncadd [#allocation6], 4294963200  ;;  %v747_v0 = vmov 0   ;;  %v822_v1 = vld [vmem:[%s899_s2] sm:$0xff]  ;;  %v827_v2 = vld [vmem:[%s899_s2 + $0x8] sm:$0xff]  ;;  %vm63_vm0 = vcmask 130048  }
  0x27   :  { %670 = vset.pattern.permute.xlu0 %v747_v0  ;;  %v832_v3 = vld [vmem:[%s898_s1] sm:$0xff]   ;;  %v592_v4 = vpack.c.bf16 %v827_v2, %v822_v1  ;;  %v174_v8 = vld [vmem:[#allocation2 + $0x88] sm:$0xff]  ;;  %v175_v14 = vld [vmem:[#allocation2 + $0x90] sm:$0xff]  ;;  %s748_s14 = smov [#allocation7]  }
  0x28   :  { %v492_v5 = vunpack.c.l.bf16 %v832_v3  ;;  %v61_v6 = vld [vmem:[%s897_s0] sm:$0xff]  ;;  %v158_v10 = vld [vmem:[#allocation2 + $0x8] sm:$0xff]  ;;  %v493_v11 = vunpack.c.h.bf16 %v832_v3  ;;  %v176_v15 = vld [vmem:[#allocation2 + $0x98] sm:$0xff]  ;;  %s471_s15 = sshll.u32 %s748_s14, 4  ;;  %s472_s15 = int_to_ptr.vmem [resolvable:$true] %s471_s15 }
  0x29   :  { %v173_v7 = vld [vmem:[#allocation2 + $0x80] sm:$0xff]  ;;  %147 = vperm.xlu0 %670, %v61_v6   ;;  %593 = vmatprep.subr.bf16.mxu1 %v592_v4  ;;  %v62_v12 = vld [vmem:[%s897_s0 + $0x8] sm:$0xff]  ;;  %v600_v17 = vpack.c.bf16 %v176_v15, %v175_v14  ;;  %v159_v18 = vld [vmem:[#allocation2 + $0x10] sm:$0xff]  ;;  %s715_s16 = scalar_lea.vmem %s472_s15, 256  ;;  %p720_p3 = scmp.lt.s32.totalorder %s472_s15, %s472_s15 }
  0x2a   :  { %v157_v9 = vld [vmem:[#allocation2] sm:$0xff]  ;;  %582 = vmatprep.mubr.msk.f32.mxu1 %vm63_vm0, %v492_v5  ;;  %v596_v13 = vpack.c.bf16 %v174_v8, %v173_v7  ;;  %595 = vmatpush3.bf16.msra.mxu1 %v592_v4  ;;  %v160_v19 = vld [vmem:[#allocation2 + $0x18] sm:$0xff]  ;;  %v178_v21 = vld [vmem:[#allocation2 + $0xa8] sm:$0xff]  ;;  %p716_p2 = scmp.ne.s32.totalorder %s472_s15, %s715_s16  ;;  %p721_p4 = scmp.lt.s32.totalorder %s715_s16, %s715_s16 }
  0x2b   :  { %v598_v16 = vpack.c.bf16 %v158_v10, %v157_v9  ;;  %589 = vmatprep.mubr.msk.f32.mxu0 %vm63_vm0, %v492_v5  ;;  %v177_v20 = vld [vmem:[#allocation2 + $0xa0] sm:$0xff]  ;;  %v602_v22 = vpack.c.bf16 %v160_v19, %v159_v18  ;;  %v162_v25 = vld [vmem:[#allocation2 + $0x28] sm:$0xff]  ;;  %v179_v26 = vld [vmem:[#allocation2 + $0xb0] sm:$0xff] }
  0x2c   :  { %597 = vmatprep.subr.bf16.mxu1 %v596_v13  ;;  %v604_v23 = vpack.c.bf16 %v178_v21, %v177_v20  ;;  %v161_v24 = vld [vmem:[#allocation2 + $0x20] sm:$0xff]  ;;  %v180_v27 = vld [vmem:[#allocation2 + $0xb8] sm:$0xff]  ;;  %v163_v30 = vld [vmem:[#allocation2 + $0x30] sm:$0xff]  ;;  %p722_p5 = por %p721_p4, %p720_p3 }
  0x2d   :  { %152 = vperm.xlu0 %670, %v62_v12   ;;  %583 = vmatmul.mubr.msk.f32.vlgmr.msra.gmra.mrb[0].mxu1 %vm63_vm0, %v493_v11  ;;  %v606_v28 = vpack.c.bf16 %v162_v25, %v161_v24  ;;  %v608_v29 = vpack.c.bf16 %v180_v27, %v179_v26  ;;  %v164_v31 = vld [vmem:[#allocation2 + $0x38] sm:$0xff]  ;;  %v181_v32 = vld [vmem:[#allocation2 + $0xc0] sm:$0xff]  ;;  %v182_v33 = vld [vmem:[#allocation2 + $0xc8] sm:$0xff] }
  0x2e   :  { %599 = vmatpush3.bf16.msra.mxu1 %v598_v16  ;;  %v610_v34 = vpack.c.bf16 %v164_v31, %v163_v30  ;;  %v612_v35 = vpack.c.bf16 %v182_v33, %v181_v32  ;;  %v165_v36 = vld [vmem:[#allocation2 + $0x40] sm:$0xff]  ;;  %v166_v37 = vld [vmem:[#allocation2 + $0x48] sm:$0xff]  ;;  %v183_v38 = vld [vmem:[#allocation2 + $0xd0] sm:$0xff]  ;;  %p723_p6 = pnand %p722_p5, %p716_p2 }
  0x2f   :  { %601 = vmatprep.subr.bf16.mxu1 %v600_v17  ;;  %v184_v39 = vld [vmem:[#allocation2 + $0xd8] sm:$0xff]  ;;  %v614_v40 = vpack.c.bf16 %v166_v37, %v165_v36  ;;  %v167_v42 = vld [vmem:[#allocation2 + $0x50] sm:$0xff]  ;;  %v185_v44 = vld [vmem:[#allocation2 + $0xe0] sm:$0xff] }
  0x30   :  { %v616_v41 = vpack.c.bf16 %v184_v39, %v183_v38  ;;  %v168_v43 = vld [vmem:[#allocation2 + $0x58] sm:$0xff]  ;;  %v186_v45 = vld [vmem:[#allocation2 + $0xe8] sm:$0xff]  ;;  %v169_v48 = vld [vmem:[#allocation2 + $0x60] sm:$0xff] }
  0x31   :  { %v618_v46 = vpack.c.bf16 %v168_v43, %v167_v42  ;;  %v620_v47 = vpack.c.bf16 %v186_v45, %v185_v44  ;;  %v170_v49 = vld [vmem:[#allocation2 + $0x68] sm:$0xff]  ;;  %v187_v51 = vld [vmem:[#allocation2 + $0xf0] sm:$0xff]  ;;  %v188_v52 = vld [vmem:[#allocation2 + $0xf8] sm:$0xff] }
  0x32   :  { %603 = vmatpush3.bf16.msra.mxu1 %v602_v22  ;;  %v622_v50 = vpack.c.bf16 %v170_v49, %v169_v48  ;;  %v624_v53 = vpack.c.bf16 %v188_v52, %v187_v51  ;;  %v171_v54 = vld [vmem:[#allocation2 + $0x70] sm:$0xff]  ;;  %v172_v55 = vld [vmem:[#allocation2 + $0x78] sm:$0xff]  ;;  %v486_v5 = vld [vmem:[%s901_s4] ss:$0 sm:$0xff] }
  0x33   :  { %605 = vmatprep.subr.bf16.mxu1 %v604_v23  ;;  %v626_v56 = vpack.c.bf16 %v172_v55, %v171_v54  ;;  %v366_v12 = vld [vmem:[#allocation5 + $0x80] sm:$0xff]  ;;  %v367_v13 = vld [vmem:[#allocation5 + $0x88] sm:$0xff]  ;;  %v368_v18 = vld [vmem:[#allocation5 + $0x90] sm:$0xff] }
  0x34   :  { %v632_v15 = vpack.c.bf16 %v367_v13, %v366_v12  ;;  %v350_v16 = vld [vmem:[#allocation5] sm:$0xff]  ;;  %v351_v17 = vld [vmem:[#allocation5 + $0x8] sm:$0xff]  ;;  %v369_v19 = vld [vmem:[#allocation5 + $0x98] sm:$0xff] }
  0x35   :  { %v634_v20 = vpack.c.bf16 %v351_v17, %v350_v16  ;;  %v636_v21 = vpack.c.bf16 %v369_v19, %v368_v18  ;;  %v352_v22 = vld [vmem:[#allocation5 + $0x10] sm:$0xff]  ;;  %v353_v23 = vld [vmem:[#allocation5 + $0x18] sm:$0xff]  ;;  %v370_v24 = vld [vmem:[#allocation5 + $0xa0] sm:$0xff] }
  0x36   :  { %607 = vmatpush3.bf16.msra.mxu1 %v606_v28  ;;  %v371_v25 = vld [vmem:[#allocation5 + $0xa8] sm:$0xff]  ;;  %v638_v26 = vpack.c.bf16 %v353_v23, %v352_v22  ;;  %v354_v28 = vld [vmem:[#allocation5 + $0x20] sm:$0xff]  ;;  %v372_v30 = vld [vmem:[#allocation5 + $0xb0] sm:$0xff] }
  0x37   :  { %609 = vmatprep.subr.bf16.mxu1 %v608_v29  ;;  %v640_v27 = vpack.c.bf16 %v371_v25, %v370_v24  ;;  %v355_v29 = vld [vmem:[#allocation5 + $0x28] sm:$0xff]  ;;  %v373_v31 = vld [vmem:[#allocation5 + $0xb8] sm:$0xff]  ;;  %v374_v36 = vld [vmem:[#allocation5 + $0xc0] sm:$0xff] }
  0x38   :  { %v642_v32 = vpack.c.bf16 %v355_v29, %v354_v28  ;;  %v644_v33 = vpack.c.bf16 %v373_v31, %v372_v30  ;;  %v375_v37 = vld [vmem:[#allocation5 + $0xc8] sm:$0xff]  ;;  %v358_v38 = vld [vmem:[#allocation5 + $0x40] sm:$0xff]  ;;  %v360_v44 = vld [vmem:[#allocation5 + $0x50] sm:$0xff] }
  0x39   :  { %v359_v39 = vld [vmem:[#allocation5 + $0x48] sm:$0xff]  ;;  %v361_v45 = vld [vmem:[#allocation5 + $0x58] sm:$0xff] }
  0x3a   :  { %611 = vmatpush3.bf16.msra.mxu1 %v610_v34  ;;  %v356_v34 = vld [vmem:[#allocation5 + $0x30] sm:$0xff]  ;;  %v650_v42 = vpack.c.bf16 %v359_v39, %v358_v38  ;;  %v654_v48 = vpack.c.bf16 %v361_v45, %v360_v44  ;;  %v363_v51 = vld [vmem:[#allocation5 + $0x68] sm:$0xff]  ;;  %v381_v54 = vld [vmem:[#allocation5 + $0xf8] sm:$0xff] }
  0x3b   :  { %613 = vmatprep.subr.bf16.mxu1 %v612_v35  ;;  %v357_v35 = vld [vmem:[#allocation5 + $0x38] sm:$0xff] }
  0x3c   :  { %v646_v3 = vpack.c.bf16 %v357_v35, %v356_v34 }
  0x3e   :  { %615 = vmatpush3.bf16.msra.mxu1 %v614_v40  ;;  %v376_v40 = vld [vmem:[#allocation5 + $0xd0] sm:$0xff] }
  0x3f   :  { %617 = vmatprep.subr.bf16.mxu1 %v616_v41  ;;  %v377_v41 = vld [vmem:[#allocation5 + $0xd8] sm:$0xff] }
  0x40   :  { %v652_v43 = vpack.c.bf16 %v377_v41, %v376_v40 }
  0x42   :  { %619 = vmatpush3.bf16.msra.mxu1 %v618_v46  ;;  %v378_v46 = vld [vmem:[#allocation5 + $0xe0] sm:$0xff] }
  0x43   :  { %621 = vmatprep.subr.bf16.mxu1 %v620_v47  ;;  %v379_v47 = vld [vmem:[#allocation5 + $0xe8] sm:$0xff] }
  0x44   :  { %v656_v49 = vpack.c.bf16 %v379_v47, %v378_v46 }
  0x46   :  { %623 = vmatpush3.bf16.msra.mxu1 %v622_v50  ;;  %v362_v50 = vld [vmem:[#allocation5 + $0x60] sm:$0xff] }
  0x47   :  { %625 = vmatprep.subr.bf16.mxu1 %v624_v53  ;;  %v658_v52 = vpack.c.bf16 %v363_v51, %v362_v50  ;;  %v380_v53 = vld [vmem:[#allocation5 + $0xf0] sm:$0xff] }
  0x48   :  { %v660_v55 = vpack.c.bf16 %v381_v54, %v380_v53 }
  0x4a   :  { %627 = vmatpush3.bf16.msra.mxu1 %v626_v56  ;;  %v364_v56 = vld [vmem:[#allocation5 + $0x70] sm:$0xff] }
  0xa8   :  { %v849_v57 = vpop.permute.xlu0 %147 }
  0xac   :  { %v851_v59 = vpop.permute.xlu0 %152 }
 0x100   :  { %v584_v58 = vpop.f32.mrb[0].mxu1 }
 0x101   :  { %v136_v60 = vpop.f32.mrb[1].mxu1  ;;  %v156_v62 = vmul.f32 %v584_v58, %v851_v59  ;;  %v365_v58 = vld [vmem:[#allocation5 + $0x78] sm:$0xff] }
 0x102   :  { %v155_v61 = vmul.f32 %v849_v57, %v136_v60  ;;  %v662_v60 = vpack.c.bf16 %v365_v58, %v364_v56 }
 0x104   :  { %260 = vmatprep.mubr.f32.mxu1 %v155_v61 }
 0x105   :  { %261 = vmatmul.mubr.f32.vlgmr.msra.gmra.mrb[2].mxu1 %v822_v1 }
 0x106   :  { %265 = vmatprep.mubr.f32.mxu1 %v156_v62 }
 0x109   :  { %266 = vmatmul.mubr.f32.gmra.mrb[4].mxu1 %v827_v2 }
 0x1d8   :  { %v530_v63 = vpop.f32.mrb[2].mxu1 }
 0x1d9   :  { %v531_v0 = vpop.f32.mrb[3].mxu1 }
 0x1da   :  { %v532_v4 = vadd.f32 %v531_v0, %v530_v63 }
 0x1dc   :  { %v533_v6 = vpop.f32.mrb[4].mxu1  ;;  %v860_v8 = vadd.f32 %v532_v4, %v486_v5 }
 0x1dd   :  { %v534_v7 = vpop.f32.mrb[5].mxu1 }
 0x1de   :  { %v535_v9 = vadd.f32 %v534_v7, %v533_v6  ;;  %v271_v1 = vmax.f32 %v860_v8, 0.0 }
 0x1e0   :  { %v862_v10 = vadd.f32 %v535_v9, %v486_v5  ;;  %v489_v5 = vld [vmem:[%s903_s6] ss:$0 sm:$0xff] }
 0x1e2   :  { %v272_v2 = vmax.f32 %v862_v10, 0.0 }
 0x1e4   :  { %v628_v14 = vpack.c.bf16 %v272_v2, %v271_v1 }
 0x1e6   :  { %629 = vmatprep.subr.bf16.mxu0 %v628_v14 }
 0x1e7   :  { %631 = vmatpush3.bf16.msra.mxu0 %v628_v14 }
 0x1e8   :  { %633 = vmatprep.subr.bf16.mxu0 %v632_v15 }
 0x1ea   :  { %590 = vmatmul.mubr.msk.f32.vlgmr.msra.gmra.mrb[0].mxu0 %vm63_vm0, %v493_v11  ;;  %v648_v11 = vpack.c.bf16 %v375_v37, %v374_v36 }
 0x1eb   :  { %635 = vmatpush3.bf16.msra.mxu0 %v634_v20 }
 0x1ec   :  { %637 = vmatprep.subr.bf16.mxu0 %v636_v21 }
 0x1ef   :  { %639 = vmatpush3.bf16.msra.mxu0 %v638_v26 }
 0x1f0   :  { %641 = vmatprep.subr.bf16.mxu0 %v640_v27 }
 0x1f3   :  { %643 = vmatpush3.bf16.msra.mxu0 %v642_v32 }
 0x1f4   :  { %645 = vmatprep.subr.bf16.mxu0 %v644_v33 }
 0x1f7   :  { %647 = vmatpush3.bf16.msra.mxu0 %v646_v3 }
 0x1f8   :  { %649 = vmatprep.subr.bf16.mxu0 %v648_v11 }
 0x1fb   :  { %651 = vmatpush3.bf16.msra.mxu0 %v650_v42 }
 0x1fc   :  { %653 = vmatprep.subr.bf16.mxu0 %v652_v43 }
 0x1ff   :  { %655 = vmatpush3.bf16.msra.mxu0 %v654_v48 }
 0x200   :  { %657 = vmatprep.subr.bf16.mxu0 %v656_v49 }
 0x203   :  { %659 = vmatpush3.bf16.msra.mxu0 %v658_v52 }
 0x204   :  { %661 = vmatprep.subr.bf16.mxu0 %v660_v55 }
 0x207   :  { %663 = vmatpush3.bf16.msra.mxu0 %v662_v60 }
 0x2bd   :  { %v591_v61 = vpop.f32.mrb[0].mxu0 }
 0x2be   :  { %v339_v62 = vpop.f32.mrb[1].mxu0  ;;  %v349_v0 = vmul.f32 %v591_v61, %v851_v59 }
 0x2bf   :  { %v348_v63 = vmul.f32 %v339_v62, %v849_v57 }
 0x2c1   :  { %453 = vmatprep.mubr.f32.mxu0 %v348_v63 }
 0x2c2   :  { %454 = vmatmul.mubr.f32.vlgmr.msra.gmra.mrb[2].mxu0 %v271_v1 }
 0x2c3   :  { %458 = vmatprep.mubr.f32.mxu0 %v349_v0 }
 0x2c6   :  { %459 = vmatmul.mubr.f32.gmra.mrb[4].mxu0 %v272_v2 }
 0x395   :  { %v572_v4 = vpop.f32.mrb[2].mxu0 }
 0x396   :  { %v573_v6 = vpop.f32.mrb[3].mxu0 }
 0x397   :  { %v574_v7 = vadd.f32 %v573_v6, %v572_v4 }
 0x399   :  { %v456_v9 = vadd.f32 %v574_v7, %v489_v5  ;;  %v575_v12 = vpop.f32.mrb[4].mxu0 }
 0x39a   :  { %v576_v57 = vpop.f32.mrb[5].mxu0 }
 0x39b   :  { %464 = vst [vmem:[#allocation7] sm:$0xff] %v456_v9  ;;  %v577_v59 = vadd.f32 %v576_v57, %v575_v12 }
 0x39d   :  { %v461_v8 = vadd.f32 %v577_v59, %v489_v5 }
 0x39f   :  { %465 = vst [vmem:[#allocation7 + $0x8] sm:$0xff] %v461_v8 }
 0x3a0   :  { %726 = shalt.err (!%p723_p6)
}
 0x3a1   :  { %s727_s18 = scalar_lea.hbm %s904_s7, 256 }
 0x3a2   :  { %p728_p7 = scmp.ne.s32.totalorder %s904_s7, %s727_s18  ;;  %p731_p8 = scmp.lt.u32.totalorder %s727_s18, %s904_s7 }
 0x3a4   :  { %p733_p9 = pnand %p731_p8, %p728_p7 }
 0x3a6   :  { %736 = shalt.err (!%p733_p9)
}
 0x3a7   :  { %477 = dma.vmem_to_hbm [thread:$0]  %s472_s15, 256, %s904_s7, [#allocation4], %s744_s11, %s744_s11, %s745_s12  }
 0x3a8   :  { %741 = dma.done.wait [#allocation4], 256  }
 0x3a9   :  { %742 = vsyncadd [#allocation4], 4294967040 }
 0x3aa   :  { %481 = vsyncpa [#allocation3], 1 }
 0x3ab   :  { %482 = vsyncpa [#allocation6], 1 }
 0x3ac   :  { %483 = vsyncpa [#allocation4], 1 }

</bundles_post_ra>
